<compile_context>
chip_gen: v6e
topology: v6e:2x2x1
jax: 0.10.0
libtpu: 0.0.40
codegen_flags: <defaults>
</compile_context>

<pallas_src>
import jax
import jax.numpy as jnp
from jax.experimental import pallas as pl
from jax.experimental.pallas import tpu as pltpu


def _round_up(x, m):
    return -(-x // m) * m


# ---------------------------------------------------------------------------
# Kernel factory: fused Critic forward for one batch tile.  All parameters
# live in one packed VMEM buffer; offsets are static Python ints (closure).
# ---------------------------------------------------------------------------
def _make_critic_kernel(sizes, offs):
    obs_dim, h1, h2, _ = sizes
    o_w1, o_w2 = offs["w1"], offs["w2"]
    o_w3o, o_w3l = offs["w3_obs"], offs["w3_lam"]
    o_b1, o_b2, o_b3 = offs["b1"], offs["b2"], offs["b3"]
    o_w4, o_b4 = offs["w4_row"], offs["b4"]

    def kernel(obs_ref, lam_ref, w_ref, out_ref):
        # Static slices of the packed parameter buffer (8-row aligned segments).
        w1 = w_ref[pl.ds(o_w1, obs_dim), pl.ds(0, h1)]
        b1 = w_ref[pl.ds(o_b1, 1), pl.ds(0, h1)]
        w2 = w_ref[pl.ds(o_w2, h1), pl.ds(0, h2)]
        b2 = w_ref[pl.ds(o_b2, 1), pl.ds(0, h2)]
        w3o = w_ref[pl.ds(o_w3o, h2), pl.ds(0, h2)]
        w3l = w_ref[pl.ds(o_w3l, 1), pl.ds(0, h2)]
        b3 = w_ref[pl.ds(o_b3, 1), pl.ds(0, h2)]
        w4 = w_ref[pl.ds(o_w4, 1), pl.ds(0, h2)]
        b4 = w_ref[pl.ds(o_b4, 1), pl.ds(0, 1)]

        # trunk: self.critic = Linear -> ReLU -> Linear -> ReLU   (MXU)
        h = jnp.maximum(
            jnp.dot(obs_ref[...], w1, preferred_element_type=jnp.float32) + b1, 0.0)
        h = jnp.maximum(
            jnp.dot(h, w2, preferred_element_type=jnp.float32) + b2, 0.0)

        # self.output[0]: Linear(h2 + 1, h2); torch.cat([h, lambda_], dim=1) is
        # folded in by the weight split:  x @ W3 == h @ W3_obs + lambda_ * w3_lam
        h = jnp.maximum(
            jnp.dot(h, w3o, preferred_element_type=jnp.float32)
            + lam_ref[...] * w3l + b3, 0.0)

        # self.output[2]: Linear(h2, 1) + Identity.  N=1 -> VPU mul + lane
        # reduction (free XLU slot) instead of a padded MXU pass.
        out_ref[...] = jnp.sum(h * w4, axis=-1, keepdims=True) + b4

    return kernel


# ---------------------------------------------------------------------------
# Parameters (deterministic synthetic weights matching the torch layer shapes)
# ---------------------------------------------------------------------------
def init_params(sizes, key):
    obs_dim, h1, h2, out_dim = sizes
    assert out_dim == 1, "critic value head"
    ks = jax.random.split(key, 9)
    s = 0.05
    return dict(
        # self.critic
        w1=jax.random.normal(ks[0], (obs_dim, h1), jnp.float32) * s,
        b1=jax.random.normal(ks[1], (1, h1), jnp.float32) * s,
        w2=jax.random.normal(ks[2], (h1, h2), jnp.float32) * s,
        b2=jax.random.normal(ks[3], (1, h2), jnp.float32) * s,
        # self.output[0]: Linear(h2 + 1, h2), split into obs-part and lambda-part
        w3_obs=jax.random.normal(ks[4], (h2, h2), jnp.float32) * s,
        w3_lam=jax.random.normal(ks[5], (1, h2), jnp.float32) * s,
        b3=jax.random.normal(ks[6], (1, h2), jnp.float32) * s,
        # self.output[2]: Linear(h2, 1), stored as a (1, h2) row for VPU reduction
        w4_row=jax.random.normal(ks[7], (1, h2), jnp.float32) * s,
        b4=jax.random.normal(ks[8], (1, 1), jnp.float32) * s,
    )


def pack_params(params, sizes):
    """One-time host-side packing of all parameters into a single (R, W) f32
    buffer with 8-row-aligned segments -> one DMA, static in-kernel slices."""
    _, h1, h2, _ = sizes
    width = max(h1, h2)
    order = ["w1", "w2", "w3_obs", "w3_lam", "b1", "b2", "b3", "w4_row", "b4"]
    segs, offsets, row = [], {}, 0
    for name in order:
        a = params[name].astype(jnp.float32)
        rows = _round_up(a.shape[0], 8)
        seg = jnp.zeros((rows, width), jnp.float32).at[:a.shape[0], :a.shape[1]].set(a)
        segs.append(seg)
        offsets[name] = row
        row += rows
    return jnp.concatenate(segs, axis=0), offsets


# ---------------------------------------------------------------------------
# Wrapper: batch-tiled pallas_call
# ---------------------------------------------------------------------------
def critic_forward(obs, lambda_, packed_w, offsets, sizes, *, block_b=512):
    """Pallas implementation of Critic.forward(obs, lambda_) -> (B, 1)."""
    obs = obs.astype(jnp.float32)
    lambda_ = lambda_.astype(jnp.float32)
    B, obs_dim = obs.shape
    assert obs_dim == sizes[0]

    # batch tile: sublane-aligned (multiple of 8), capped at block_b
    tb = max(8, min(_round_up(B, 8), _round_up(block_b, 8)))
    Bp = _round_up(B, tb)
    if Bp != B:
        pad = Bp - B
        obs = jnp.pad(obs, ((0, pad), (0, 0)))
        lambda_ = jnp.pad(lambda_, ((0, pad), (0, 0)))

    kernel = _make_critic_kernel(sizes, offsets)
    R, Wd = packed_w.shape

    out = pl.pallas_call(
        kernel,
        out_shape=jax.ShapeDtypeStruct((Bp, 1), jnp.float32),
        grid=(Bp // tb,),
        in_specs=[
            pl.BlockSpec((tb, obs_dim), lambda i: (i, 0)),   # obs batch tile
            pl.BlockSpec((tb, 1), lambda i: (i, 0)),         # lambda_ batch tile
            pl.BlockSpec((R, Wd), lambda i: (0, 0)),         # packed params: DMA'd once
        ],
        out_specs=pl.BlockSpec((tb, 1), lambda i: (i, 0)),
        compiler_params=pltpu.CompilerParams(
            dimension_semantics=("parallel",)),               # batch sharded over TCs
    )(obs, lambda_, packed_w)
    return out[:B]


# ---------------------------------------------------------------------------
# Pure-JAX reference (mirrors the PyTorch forward exactly, with the concat)
# ---------------------------------------------------------------------------
def _reference_forward(obs, lambda_, params):
    h = jnp.maximum(obs @ params["w1"] + params["b1"], 0.0)
    h = jnp.maximum(h @ params["w2"] + params["b2"], 0.0)
    x = jnp.concatenate([h, lambda_], axis=-1)                       # torch.cat dim=1
    w3 = jnp.concatenate([params["w3_obs"], params["w3_lam"]], axis=0)
    h = jnp.maximum(x @ w3 + params["b3"], 0.0)
    return h @ params["w4_row"].T + params["b4"]


if __name__ == "__main__":
    # Critic(sizes=[16, 64, 64, 1], use_lambda=True, use_mate=False, use_gcn=False)
    sizes = [16, 64, 64, 1]
    B = 8

    key = jax.random.PRNGKey(0)
    k_obs, k_lam, k_p = jax.random.split(key, 3)
    obs = jax.random.normal(k_obs, (B, sizes[0]), jnp.float32)
    lambda_ = jax.random.normal(k_lam, (B, 1), jnp.float32)

    params = init_params(sizes, k_p)
    packed_w, offsets = pack_params(params, sizes)   # one-time packing

    result = critic_forward(obs, lambda_, packed_w, offsets, sizes)
    result = jax.block_until_ready(result)

    ref = _reference_forward(obs, lambda_, params)
    assert result.shape == (B, 1)
    assert jnp.allclose(result, ref, atol=1e-5, rtol=1e-5)

    print("KERNEL_OK")
</pallas_src>

<mosaic_0001>
module attributes {stable_mosaic.version = 11 : i64} {
  func.func @kernel(%arg0: i32, %arg1: memref<8x16xf32, #tpu.memory_space<vmem>>, %arg2: memref<8x1xf32, #tpu.memory_space<vmem>>, %arg3: memref<192x64xf32, #tpu.memory_space<vmem>>, %arg4: memref<8x1xf32, #tpu.memory_space<vmem>>) attributes {dimension_semantics = [#tpu.dimension_semantics<parallel>], iteration_bounds = array<i64: 1>, scalar_prefetch = 0 : i64, scratch_operands = 0 : i64, tpu.core_type = #tpu.core_type<tc>, window_params = [{transform_indices = @transform_0, window_bounds = array<i64: 8, 16>}, {transform_indices = @transform_1, window_bounds = array<i64: 8, 1>}, {pipeline_mode = #tpu.pipeline_mode<synchronous>, transform_indices = @transform_2, window_bounds = array<i64: 192, 64>}, {transform_indices = @transform_3, window_bounds = array<i64: 8, 1>}]} {
    %c0 = arith.constant 0 : index
    %c0_0 = arith.constant 0 : index
    %0 = vector.load %arg3[%c0, %c0_0] : memref<192x64xf32, #tpu.memory_space<vmem>>, vector<16x64xf32>
    %c152 = arith.constant 152 : index
    %c0_1 = arith.constant 0 : index
    %1 = vector.load %arg3[%c152, %c0_1] : memref<192x64xf32, #tpu.memory_space<vmem>>, vector<1x64xf32>
    %c16 = arith.constant 16 : index
    %c0_2 = arith.constant 0 : index
    %2 = vector.load %arg3[%c16, %c0_2] : memref<192x64xf32, #tpu.memory_space<vmem>>, vector<64x64xf32>
    %c160 = arith.constant 160 : index
    %c0_3 = arith.constant 0 : index
    %3 = vector.load %arg3[%c160, %c0_3] : memref<192x64xf32, #tpu.memory_space<vmem>>, vector<1x64xf32>
    %c80 = arith.constant 80 : index
    %c0_4 = arith.constant 0 : index
    %4 = vector.load %arg3[%c80, %c0_4] : memref<192x64xf32, #tpu.memory_space<vmem>>, vector<64x64xf32>
    %c144 = arith.constant 144 : index
    %c0_5 = arith.constant 0 : index
    %5 = vector.load %arg3[%c144, %c0_5] : memref<192x64xf32, #tpu.memory_space<vmem>>, vector<1x64xf32>
    %c168 = arith.constant 168 : index
    %c0_6 = arith.constant 0 : index
    %6 = vector.load %arg3[%c168, %c0_6] : memref<192x64xf32, #tpu.memory_space<vmem>>, vector<1x64xf32>
    %c176 = arith.constant 176 : index
    %c0_7 = arith.constant 0 : index
    %7 = vector.load %arg3[%c176, %c0_7] : memref<192x64xf32, #tpu.memory_space<vmem>>, vector<1x64xf32>
    %c184 = arith.constant 184 : index
    %c0_8 = arith.constant 0 : index
    %8 = vector.load %arg3[%c184, %c0_8] : memref<192x64xf32, #tpu.memory_space<vmem>>, vector<1x1xf32>
    %c0_9 = arith.constant 0 : index
    %c0_10 = arith.constant 0 : index
    %9 = vector.load %arg1[%c0_9, %c0_10] : memref<8x16xf32, #tpu.memory_space<vmem>>, vector<8x16xf32>
    %cst = arith.constant dense<0.000000e+00> : vector<8x64xf32>
    %10 = tpu.matmul %9, %0, %cst {dimension_numbers = #tpu.dot_dimension_numbers<[1], [0], [0], [1], [0, 0, 1, 1], [], []>} : vector<8x16xf32>, vector<16x64xf32>, vector<8x64xf32> -> vector<8x64xf32>
    %11 = vector.broadcast %1 : vector<1x64xf32> to vector<8x64xf32>
    %12 = arith.addf %10, %11 : vector<8x64xf32>
    %cst_11 = arith.constant 0.000000e+00 : f32
    %13 = vector.broadcast %cst_11 : f32 to vector<8x64xf32>
    %14 = arith.maximumf %12, %13 : vector<8x64xf32>
    %cst_12 = arith.constant dense<0.000000e+00> : vector<8x64xf32>
    %15 = tpu.matmul %14, %2, %cst_12 {dimension_numbers = #tpu.dot_dimension_numbers<[1], [0], [0], [1], [0, 0, 1, 1], [], []>} : vector<8x64xf32>, vector<64x64xf32>, vector<8x64xf32> -> vector<8x64xf32>
    %16 = vector.broadcast %3 : vector<1x64xf32> to vector<8x64xf32>
    %17 = arith.addf %15, %16 : vector<8x64xf32>
    %cst_13 = arith.constant 0.000000e+00 : f32
    %18 = vector.broadcast %cst_13 : f32 to vector<8x64xf32>
    %19 = arith.maximumf %17, %18 : vector<8x64xf32>
    %cst_14 = arith.constant dense<0.000000e+00> : vector<8x64xf32>
    %20 = tpu.matmul %19, %4, %cst_14 {dimension_numbers = #tpu.dot_dimension_numbers<[1], [0], [0], [1], [0, 0, 1, 1], [], []>} : vector<8x64xf32>, vector<64x64xf32>, vector<8x64xf32> -> vector<8x64xf32>
    %c0_15 = arith.constant 0 : index
    %c0_16 = arith.constant 0 : index
    %21 = vector.load %arg2[%c0_15, %c0_16] : memref<8x1xf32, #tpu.memory_space<vmem>>, vector<8x1xf32>
    %22 = vector.broadcast %21 : vector<8x1xf32> to vector<8x64xf32>
    %23 = vector.broadcast %5 : vector<1x64xf32> to vector<8x64xf32>
    %24 = arith.mulf %22, %23 : vector<8x64xf32>
    %25 = arith.addf %20, %24 : vector<8x64xf32>
    %26 = vector.broadcast %6 : vector<1x64xf32> to vector<8x64xf32>
    %27 = arith.addf %25, %26 : vector<8x64xf32>
    %cst_17 = arith.constant 0.000000e+00 : f32
    %28 = vector.broadcast %cst_17 : f32 to vector<8x64xf32>
    %29 = arith.maximumf %27, %28 : vector<8x64xf32>
    %30 = vector.broadcast %7 : vector<1x64xf32> to vector<8x64xf32>
    %31 = arith.mulf %29, %30 : vector<8x64xf32>
    %cst_18 = arith.constant dense<0.000000e+00> : vector<8xf32>
    %32 = vector.multi_reduction <add>, %31, %cst_18 [1] : vector<8x64xf32> to vector<8xf32>
    %33 = vector.shape_cast %32 : vector<8xf32> to vector<8x1xf32>
    %34 = vector.broadcast %8 : vector<1x1xf32> to vector<8x1xf32>
    %35 = arith.addf %33, %34 : vector<8x1xf32>
    %c0_19 = arith.constant 0 : index
    %c0_20 = arith.constant 0 : index
    %36 = vector.load %arg4[%c0_19, %c0_20] : memref<8x1xf32, #tpu.memory_space<vmem>>, vector<8x1xf32>
    tpu.vector_store %arg4[%c0_19, %c0_20], %35 {strides = array<i32>} : memref<8x1xf32, #tpu.memory_space<vmem>>, vector<8x1xf32>,
    return
  }
  func.func @transform_0(%arg0: i32) -> (i32, i32) {
    %c0_i32 = arith.constant 0 : i32
    %c0_i32_0 = arith.constant 0 : i32
    return %arg0, %c0_i32 : i32, i32
  }
  func.func @transform_1(%arg0: i32) -> (i32, i32) {
    %c0_i32 = arith.constant 0 : i32
    %c0_i32_0 = arith.constant 0 : i32
    return %arg0, %c0_i32 : i32, i32
  }
  func.func @transform_2(%arg0: i32) -> (i32, i32) {
    %c0_i32 = arith.constant 0 : i32
    %c0_i32_0 = arith.constant 0 : i32
    %c0_i32_1 = arith.constant 0 : i32
    return %c0_i32, %c0_i32_0 : i32, i32
  }
  func.func @transform_3(%arg0: i32) -> (i32, i32) {
    %c0_i32 = arith.constant 0 : i32
    %c0_i32_0 = arith.constant 0 : i32
    return %arg0, %c0_i32 : i32, i32
  }
}

</mosaic_0001>

<bundles_post_ra>
// kernel: tpu_custom_call.1
= control target key start
LH: loop header
LB: loop body
LE: loop exit
PB: predicated region body
PF: predicated region fallthrough
CT: control target
= control target key end

     0   :  { %v385_v0 = vmov 0.0   ;;  %vm386_vm0 = vmmov 0   ;;  %vm43_vm1 = vcmask 130048   ;;  %vm122_vm2 = vcmask 523264   ;;  %s516_s2 = inlined_call_operand.vmem [shape: f32[192,64], index: 2, kind: input, shape index: {}]   ;;  %s517_s0 = inlined_call_operand.vmem [shape: f32[8,16], index: 0, kind: input, shape index: {}]   ;;  %s518_s1 = inlined_call_operand.vmem [shape: f32[8,1], index: 1, kind: input, shape index: {}]   ;;  %s519_s3 = inlined_call_operand.vmem [shape: f32[8,1], index: 3, kind: output, shape index: {}]  }
   0x1   :  { %336 = vmatprep.subr.mxu0 %v385_v0  ;;  %v15_v1 = vld [vmem:[%s516_s2 + $0x8] sm:$0xff]  ;;  %v14_v2 = vld [vmem:[%s516_s2] sm:$0xff]  ;;  %340 = vmatprep.mubr.msk.f32.mxu0 %vm386_vm0, %v385_v0  ;;  %v22_v6 = vld [vmem:[%s516_s2 + $0x38] sm:$0xff]  ;;  %v387_v25 = vmov 0   ;;  %vm300_vm3 = vcmask 7168  }
   0x2   :  { %337 = vmatpush3.msra.mxu0 %v15_v1  ;;  %v38_v3 = vld [vmem:[%s517_s0] sm:$0xff]  ;;  %343 = vmatprep.subr.mxu1 %v385_v0  ;;  %v24_v4 = vld [vmem:[%s516_s2 + $0x48] sm:$0xff]  ;;  %v21_v7 = vld [vmem:[%s516_s2 + $0x30] sm:$0xff] }
   0x3   :  { %v23_v5 = vld [vmem:[%s516_s2 + $0x40] sm:$0xff]  ;;  %338 = vmatprep.subr.mxu0 %v385_v0  ;;  %344 = vmatpush3.msra.mxu1 %v24_v4  ;;  %v20_v8 = vld [vmem:[%s516_s2 + $0x28] sm:$0xff]  ;;  %v18_v10 = vld [vmem:[%s516_s2 + $0x18] sm:$0xff] }
   0x4   :  { %339 = vmatpush3.msra.mxu0 %v14_v2  ;;  %345 = vmatprep.subr.mxu1 %v385_v0  ;;  %v19_v9 = vld [vmem:[%s516_s2 + $0x20] sm:$0xff]  ;;  %v17_v11 = vld [vmem:[%s516_s2 + $0x10] sm:$0xff]  ;;  %v33_v12 = vld [vmem:[%s516_s2 + $0x88] sm:$0xff] }
   0x5   :  { %341 = vmatmul.mubr.msk.f32.vlgmr.msra.gmra.mxu0 %vm43_vm1, %v38_v3  ;;  %346 = vmatpush3.msra.mxu1 %v23_v5  ;;  %v32_v13 = vld [vmem:[%s516_s2 + $0x80] sm:$0xff]  ;;  %v31_v14 = vld [vmem:[%s516_s2 + $0x78] sm:$0xff]  ;;  %v30_v15 = vld [vmem:[%s516_s2 + $0x70] sm:$0xff] }
   0x6   :  { %347 = vmatprep.subr.mxu1 %v385_v0  ;;  %359 = vmatprep.mubr.msk.f32.mxu1 %vm386_vm0, %v385_v0  ;;  %v29_v16 = vld [vmem:[%s516_s2 + $0x68] sm:$0xff]  ;;  %v306_v17 = vld [vmem:[%s516_s2 + $0x98] ss:$0 sm:$0xff]  ;;  %v28_v22 = vld [vmem:[%s516_s2 + $0x60] sm:$0xff] }
   0x7   :  { %348 = vmatpush3.msra.mxu1 %v22_v6  ;;  %362 = vmatprep.subr.mxu0 %v385_v0  ;;  %v27_v23 = vld [vmem:[%s516_s2 + $0x58] sm:$0xff]  ;;  %v26_v24 = vld [vmem:[%s516_s2 + $0x50] sm:$0xff]  ;;  %v197_v26 = vld [vmem:[%s518_s1] sm:$0xff] }
   0x8   :  { %349 = vmatprep.subr.mxu1 %v385_v0  ;;  %378 = vmatprep.mubr.msk.f32.mxu0 %vm386_vm0, %v385_v0  ;;  %v308_v27 = vld [vmem:[%s516_s2 + $0xa0] ss:$0 sm:$0xff]  ;;  %v310_v32 = vld [vmem:[%s516_s2 + $0x90] ss:$0 sm:$0xff]  ;;  %v312_v35 = vld [vmem:[%s516_s2 + $0xa8] ss:$0 sm:$0xff] }
   0x9   :  { %350 = vmatpush3.msra.mxu1 %v21_v7  ;;  %363 = vmatpush3.msra.mxu0 %v33_v12  ;;  %v313_v40 = vld [vmem:[%s516_s2 + $0xb0] ss:$0 sm:$0xff]  ;;  %v314_v44 = vld [vmem:[%s516_s2 + $0xb8] ss:$0 sm:$0xff] }
   0xa   :  { %351 = vmatprep.subr.mxu1 %v385_v0  ;;  %364 = vmatprep.subr.mxu0 %v385_v0 }
   0xb   :  { %352 = vmatpush3.msra.mxu1 %v20_v8  ;;  %365 = vmatpush3.msra.mxu0 %v32_v13 }
   0xc   :  { %353 = vmatprep.subr.mxu1 %v385_v0  ;;  %366 = vmatprep.subr.mxu0 %v385_v0 }
   0xd   :  { %354 = vmatpush3.msra.mxu1 %v19_v9  ;;  %367 = vmatpush3.msra.mxu0 %v31_v14 }
   0xe   :  { %355 = vmatprep.subr.mxu1 %v385_v0  ;;  %368 = vmatprep.subr.mxu0 %v385_v0 }
   0xf   :  { %356 = vmatpush3.msra.mxu1 %v18_v10  ;;  %369 = vmatpush3.msra.mxu0 %v30_v15 }
  0x10   :  { %357 = vmatprep.subr.mxu1 %v385_v0  ;;  %370 = vmatprep.subr.mxu0 %v385_v0 }
  0x11   :  { %358 = vmatpush3.msra.mxu1 %v17_v11  ;;  %371 = vmatpush3.msra.mxu0 %v29_v16 }
  0x12   :  { %372 = vmatprep.subr.mxu0 %v385_v0  ;;  %384 = vset.pattern.permute.xlu0 %v387_v25 }
  0x13   :  { %373 = vmatpush3.msra.mxu0 %v28_v22  ;;  %200 = vperm.xlu0 %384, %v197_v26  }
  0x14   :  { %374 = vmatprep.subr.mxu0 %v385_v0 }
  0x15   :  { %375 = vmatpush3.msra.mxu0 %v27_v23 }
  0x16   :  { %376 = vmatprep.subr.mxu0 %v385_v0 }
  0x17   :  { %377 = vmatpush3.msra.mxu0 %v26_v24 }
  0x8e   :  { %v201_v33 = vpop.permute.xlu0 %200 }
  0x8f   :  { %v207_v34 = vmul.f32 %v310_v32, %v201_v33 }
  0xc5   :  { %v113_v18 = vpop.f32.mrf.mxu0 }
  0xc6   :  { %v114_v19 = vadd.f32 %v306_v17, %v113_v18 }
  0xc7   :  { %v342_v20 = vpop.f32.mrf.mxu0 }
  0xc8   :  { %v117_v21 = vmax.f32 %v114_v19, 0.0 }
  0xca   :  { %360 = vmatmul.mubr.msk.f32.vlgmr.msra.gmra.mxu1 %vm122_vm2, %v117_v21 }
 0x18a   :  { %v192_v28 = vpop.f32.mrf.mxu1 }
 0x18b   :  { %v193_v29 = vadd.f32 %v308_v27, %v192_v28 }
 0x18c   :  { %v361_v30 = vpop.f32.mrf.mxu1 }
 0x18d   :  { %v196_v31 = vmax.f32 %v193_v29, 0.0 }
 0x18f   :  { %379 = vmatmul.mubr.msk.f32.vlgmr.msra.gmra.mxu0 %vm122_vm2, %v196_v31 }
 0x24f   :  { %v277_v36 = vpop.f32.mrf.mxu0 }
 0x250   :  { %v278_v37 = vadd.f32 %v277_v36, %v207_v34 }
 0x251   :  { %v380_v38 = vpop.f32.mrf.mxu0 }
 0x252   :  { %v285_v39 = vadd.f32 %v312_v35, %v278_v37 }
 0x254   :  { %v286_v41 = vmax.f32 %v285_v39, 0.0 }
 0x256   :  { %v291_v42 = vmul.f32 %v313_v40, %v286_v41 }
 0x258   :  { %v292_v43 = vsel %vm122_vm2, %v291_v42, 0.0 }
 0x259   :  { %293 = vadd.xlane.f32.xlu0 %v292_v43 }
 0x2e2   :  { %v294_v45 = vpop.xlane.xlu0 %293 }
 0x2e3   :  { %v299_v46 = vadd.f32 %v314_v44, %v294_v45 }
 0x2e5   :  { %301 = vst.msk [vmem:[%s519_s3] sm:$0xff] %vm300_vm3, %v299_v46 }

</bundles_post_ra>
